<compile_context>
chip_gen: v6e
topology: v6e:2x2x1
jax: 0.10.0
libtpu: 0.0.40
codegen_flags: <defaults>
</compile_context>

<pallas_src>
import functools

import jax
import jax.numpy as jnp
from jax import lax
from jax.experimental import pallas as pl
from jax.experimental.pallas import tpu as pltpu


def _adain_kernel(s_ref, t_ref, fake_s_ref, fake_t_ref, mom_ref, *, eps):
    s = s_ref[...].astype(jnp.float32)          # (T, H*W)   source rows
    t = t_ref[...].astype(jnp.float32)          # (T, _H*_W) target rows

    hw_s = s.shape[-1]
    hw_t = t.shape[-1]
    # torch.var() is unbiased (n-1).  NOTE: for H*W == 1 torch yields NaN
    # (0/0); we clamp the denominator to 1, giving variance 0 instead.
    denom_s = max(hw_s - 1, 1)
    denom_t = max(hw_t - 1, 1)

    # ---- source per-(N,C) statistics; one pass over the centered data ------
    s_mean = jnp.mean(s, axis=-1, keepdims=True)
    s_cent = s - s_mean
    s_c2 = s_cent * s_cent
    s_sum2 = jnp.sum(s_c2, axis=-1, keepdims=True)
    s_sum3 = jnp.sum(s_c2 * s_cent, axis=-1, keepdims=True)
    s_sum4 = jnp.sum(s_c2 * s_c2, axis=-1, keepdims=True)
    s_var = s_sum2 / denom_s
    s_inv = lax.rsqrt(s_var + eps)              # 1/sqrt(var+eps), (T,1) only
    s_std = (s_var + eps) * s_inv               # sqrt(var+eps),   (T,1) only

    # ---- target per-(N,C) statistics ---------------------------------------
    t_mean = jnp.mean(t, axis=-1, keepdims=True)
    t_cent = t - t_mean
    t_c2 = t_cent * t_cent
    t_sum2 = jnp.sum(t_c2, axis=-1, keepdims=True)
    t_sum3 = jnp.sum(t_c2 * t_cent, axis=-1, keepdims=True)
    t_sum4 = jnp.sum(t_c2 * t_c2, axis=-1, keepdims=True)
    t_var = t_sum2 / denom_t
    t_inv = lax.rsqrt(t_var + eps)
    t_std = (t_var + eps) * t_inv

    # ---- style swap with folded per-row scales (1 full-tile mul each) ------
    fake_s_ref[...] = (t_cent * (t_inv * s_std) + s_mean).astype(fake_s_ref.dtype)
    fake_t_ref[...] = (s_cent * (s_inv * t_std) + t_mean).astype(fake_t_ref.dtype)

    # ---- per-tile partial sums for global skew / kurtosis ------------------
    # Sum over row of norm^k = inv^k * Sum(c^k)  (inv is constant per row).
    s_inv2 = s_inv * s_inv
    t_inv2 = t_inv * t_inv
    p_s3 = jnp.sum(s_sum3 * (s_inv2 * s_inv))
    p_s4 = jnp.sum(s_sum4 * (s_inv2 * s_inv2))
    p_t3 = jnp.sum(t_sum3 * (t_inv2 * t_inv))
    p_t4 = jnp.sum(t_sum4 * (t_inv2 * t_inv2))

    lane = lax.broadcasted_iota(jnp.int32, mom_ref.shape, 2)
    packed = jnp.where(lane == 0, p_s3,
             jnp.where(lane == 1, p_s4,
             jnp.where(lane == 2, p_t3,
             jnp.where(lane == 3, p_t4, jnp.float32(0.0)))))
    mom_ref[...] = packed.astype(jnp.float32)


def _round_up(a, b):
    return (a + b - 1) // b * b


def _vmem_limits():
    """(vmem_limit_bytes, tile_budget_bytes), generation-aware."""
    try:
        cap = int(pltpu.get_tpu_info().vmem_capacity_bytes)
    except Exception:  # pragma: no cover - conservative fallback
        cap = 64 << 20
    # ~75% of physical VMEM (=> ~96 MiB on v5e/v6e, ~48 MiB on v7x per-TC),
    # with some floor, and an extra ~15% headroom for compiler internals when
    # picking the tile size.
    limit = max(32 << 20, min(int(cap * 0.75), cap - (8 << 20)))
    budget = int(limit * 0.85)
    return limit, budget


def _choose_tiling(num_rows, bytes_per_row, budget_bytes):
    """Row tile T (multiple of 8), padded row count, tile count (even if >1)."""
    r8 = _round_up(max(num_rows, 1), 8)
    cap = max(8, (budget_bytes // max(bytes_per_row, 1)) // 8 * 8)
    tile = min(cap, r8)
    if r8 > 8:
        # Prefer an even number of >=2 tiles: enables BlockSpec pipelining and
        # an even 2-TensorCore split of the "parallel" grid axis on v7x.
        num = max(2, _round_up(-(-r8 // tile), 2))
        tile = min(tile, _round_up(-(-r8 // num), 8))
    tile = max(tile, 8)
    r_pad = _round_up(r8, tile)
    num_tiles = r_pad // tile
    if num_tiles > 1 and num_tiles % 2 == 1:
        num_tiles += 1
        r_pad = num_tiles * tile
    return tile, r_pad, num_tiles


def adain(source_feat, target_feat, eps=1e-5):
    """Pallas implementation of Adain.forward.

    Args:
      source_feat: (N, C, H, W)
      target_feat: (_N, _C, _H, _W) with _N*_C == N*C (same implicit broadcast
                   requirement as the PyTorch module).
    Returns:
      (fake_source_feat, fake_target_feat,
       source_skews, target_skews, source_kurtoses, target_kurtoses)
    """
    N, C, H, W = source_feat.shape
    _N, _C, _H, _W = target_feat.shape
    R = N * C
    if _N * _C != R:
        raise ValueError("Adain requires target N*C == source N*C "
                         "(same implicit broadcast as the PyTorch module).")
    hw_s = H * W
    hw_t = _H * _W

    s2 = source_feat.reshape(R, hw_s)
    t2 = target_feat.reshape(R, hw_t)

    # fake_source = target_norm * source_std + source_mean -> promoted dtype.
    out_dtype = jnp.promote_types(source_feat.dtype, target_feat.dtype)
    s_item = jnp.dtype(s2.dtype).itemsize
    t_item = jnp.dtype(t2.dtype).itemsize
    o_item = jnp.dtype(out_dtype).itemsize

    # --- VMEM accounting per tile row -------------------------------------
    # Double-buffered pipeline tiles (2x each input + each output row) plus
    # ~5 live full-tile f32 temporaries per tensor inside the kernel body
    # (cast input / centered / c^2 / transient products).
    pipeline_bytes_per_row = 2 * (hw_s * (s_item + o_item) + hw_t * (t_item + o_item))
    live_f32_per_side = 5
    temp_bytes_per_row = live_f32_per_side * 4 * (hw_s + hw_t)
    bytes_per_row = pipeline_bytes_per_row + temp_bytes_per_row

    vmem_limit, vmem_budget = _vmem_limits()
    T, R_pad, num_tiles = _choose_tiling(R, bytes_per_row, vmem_budget)
    # TODO(synk): for very large H*W (row footprint >> VMEM budget at T=8),
    # add a second "arbitrary" grid axis over the spatial dim with lane-masked
    # reductions instead of relying on a single full-extent lane block.

    if R_pad > R:
        pad = R_pad - R
        s2 = jnp.pad(s2, ((0, pad), (0, 0)))
        t2 = jnp.pad(t2, ((0, pad), (0, 0)))

    kernel = functools.partial(_adain_kernel, eps=float(eps))

    out_shape = (
        jax.ShapeDtypeStruct((R_pad, hw_t), out_dtype),          # fake_source rows
        jax.ShapeDtypeStruct((R_pad, hw_s), out_dtype),          # fake_target rows
        jax.ShapeDtypeStruct((num_tiles, 1, 128), jnp.float32),  # moment partials
    )
    in_specs = [
        pl.BlockSpec((T, hw_s), lambda i: (i, 0)),
        pl.BlockSpec((T, hw_t), lambda i: (i, 0)),
    ]
    out_specs = (
        pl.BlockSpec((T, hw_t), lambda i: (i, 0)),
        pl.BlockSpec((T, hw_s), lambda i: (i, 0)),
        pl.BlockSpec((1, 1, 128), lambda i: (i, 0, 0)),
    )

    fake_s2, fake_t2, mom = pl.pallas_call(
        kernel,
        out_shape=out_shape,
        grid=(num_tiles,),
        in_specs=in_specs,
        out_specs=out_specs,
        compiler_params=pltpu.CompilerParams(
            dimension_semantics=("parallel",),
            vmem_limit_bytes=vmem_limit,
        ),
    )(s2, t2)

    # Finalize the global higher-order moments from the per-tile partial sums.
    # Padded rows are all-zero -> centered values are zero -> contribute 0.
    mom_sums = jnp.sum(mom[:, 0, :4], axis=0)        # (4,)
    n_s = jnp.float32(R * hw_s)
    n_t = jnp.float32(R * hw_t)
    source_skews = jnp.abs(mom_sums[0] / n_s)
    source_kurtoses = jnp.abs(mom_sums[1] / n_s - 3.0)
    target_skews = jnp.abs(mom_sums[2] / n_t)
    target_kurtoses = jnp.abs(mom_sums[3] / n_t - 3.0)

    fake_source = fake_s2[:R].reshape(_N, _C, _H, _W)
    fake_target = fake_t2[:R].reshape(N, C, H, W)

    return (fake_source, fake_target,
            source_skews, target_skews, source_kurtoses, target_kurtoses)


def _adain_ref(source_feat, target_feat, eps=1e-5):
    # Pure-JAX reference mirroring the PyTorch module semantics.
    N, C, H, W = source_feat.shape
    _N, _C, _H, _W = target_feat.shape
    s = source_feat.reshape(N, C, -1)
    t = target_feat.reshape(_N, _C, -1)
    s_mean = s.mean(-1, keepdims=True)
    s_var = s.var(-1, keepdims=True, ddof=1)
    s_norm = (s - s_mean) / jnp.sqrt(s_var + eps)
    t_mean = t.mean(-1, keepdims=True)
    t_var = t.var(-1, keepdims=True, ddof=1)
    t_norm = (t - t_mean) / jnp.sqrt(t_var + eps)
    fake_s = (t_norm * jnp.sqrt(s_var + eps) + s_mean).reshape(_N, _C, _H, _W)
    fake_t = (s_norm * jnp.sqrt(t_var + eps) + t_mean).reshape(N, C, H, W)
    s_skew = jnp.abs(jnp.mean(s_norm ** 3))
    s_kurt = jnp.abs(jnp.mean(s_norm ** 4) - 3.0)
    t_skew = jnp.abs(jnp.mean(t_norm ** 3))
    t_kurt = jnp.abs(jnp.mean(t_norm ** 4) - 3.0)
    return fake_s, fake_t, s_skew, t_skew, s_kurt, t_kurt


if __name__ == "__main__":
    key = jax.random.PRNGKey(0)
    k1, k2 = jax.random.split(key)
    N, C, H, W = 2, 4, 16, 16
    source = jax.random.normal(k1, (N, C, H, W), dtype=jnp.float32) * 2.0 + 0.5
    target = jax.random.normal(k2, (N, C, H, W), dtype=jnp.float32) * 0.7 - 1.0

    outs = adain(source, target)
    outs = jax.block_until_ready(outs)

    refs = _adain_ref(source, target)
    for o, r in zip(outs, refs):
        assert jnp.allclose(o, r, rtol=1e-4, atol=1e-4), "mismatch vs reference"

    print("KERNEL_OK")
</pallas_src>

<mosaic_0001>
module attributes {stable_mosaic.version = 11 : i64} {
  func.func @_adain_kernel(%arg0: i32, %arg1: memref<8x256xf32, #tpu.memory_space<vmem>>, %arg2: memref<8x256xf32, #tpu.memory_space<vmem>>, %arg3: memref<8x256xf32, #tpu.memory_space<vmem>>, %arg4: memref<8x256xf32, #tpu.memory_space<vmem>>, %arg5: memref<1x1x128xf32, #tpu.memory_space<vmem>>) attributes {dimension_semantics = [#tpu.dimension_semantics<parallel>], iteration_bounds = array<i64: 1>, scalar_prefetch = 0 : i64, scratch_operands = 0 : i64, tpu.core_type = #tpu.core_type<tc>, window_params = [{transform_indices = @transform_0, window_bounds = array<i64: 8, 256>}, {transform_indices = @transform_1, window_bounds = array<i64: 8, 256>}, {transform_indices = @transform_2, window_bounds = array<i64: 8, 256>}, {transform_indices = @transform_3, window_bounds = array<i64: 8, 256>}, {transform_indices = @transform_4, window_bounds = array<i64: 1, 1, 128>}]} {
    %c0 = arith.constant 0 : index
    %c0_0 = arith.constant 0 : index
    %0 = vector.load %arg1[%c0, %c0_0] : memref<8x256xf32, #tpu.memory_space<vmem>>, vector<8x256xf32>
    %c0_1 = arith.constant 0 : index
    %c0_2 = arith.constant 0 : index
    %1 = vector.load %arg2[%c0_1, %c0_2] : memref<8x256xf32, #tpu.memory_space<vmem>>, vector<8x256xf32>
    %cst = arith.constant dense<0.000000e+00> : vector<8xf32>
    %2 = vector.multi_reduction <add>, %0, %cst [1] : vector<8x256xf32> to vector<8xf32>
    %3 = vector.shape_cast %2 : vector<8xf32> to vector<8x1xf32>
    %cst_3 = arith.constant 2.560000e+02 : f32
    %4 = vector.broadcast %cst_3 : f32 to vector<8x1xf32>
    %5 = arith.divf %3, %4 : vector<8x1xf32>
    %6 = vector.broadcast %5 : vector<8x1xf32> to vector<8x256xf32>
    %7 = arith.subf %0, %6 : vector<8x256xf32>
    %8 = arith.mulf %7, %7 : vector<8x256xf32>
    %cst_4 = arith.constant dense<0.000000e+00> : vector<8xf32>
    %9 = vector.multi_reduction <add>, %8, %cst_4 [1] : vector<8x256xf32> to vector<8xf32>
    %10 = vector.shape_cast %9 : vector<8xf32> to vector<8x1xf32>
    %11 = arith.mulf %8, %7 : vector<8x256xf32>
    %cst_5 = arith.constant dense<0.000000e+00> : vector<8xf32>
    %12 = vector.multi_reduction <add>, %11, %cst_5 [1] : vector<8x256xf32> to vector<8xf32>
    %13 = vector.shape_cast %12 : vector<8xf32> to vector<8x1xf32>
    %14 = arith.mulf %8, %8 : vector<8x256xf32>
    %cst_6 = arith.constant dense<0.000000e+00> : vector<8xf32>
    %15 = vector.multi_reduction <add>, %14, %cst_6 [1] : vector<8x256xf32> to vector<8xf32>
    %16 = vector.shape_cast %15 : vector<8xf32> to vector<8x1xf32>
    %cst_7 = arith.constant 2.550000e+02 : f32
    %17 = vector.broadcast %cst_7 : f32 to vector<8x1xf32>
    %18 = arith.divf %10, %17 : vector<8x1xf32>
    %cst_8 = arith.constant 9.99999974E-6 : f32
    %19 = vector.broadcast %cst_8 : f32 to vector<8x1xf32>
    %20 = arith.addf %18, %19 : vector<8x1xf32>
    %21 = math.rsqrt %20 : vector<8x1xf32>
    %cst_9 = arith.constant 9.99999974E-6 : f32
    %22 = vector.broadcast %cst_9 : f32 to vector<8x1xf32>
    %23 = arith.addf %18, %22 : vector<8x1xf32>
    %24 = arith.mulf %23, %21 : vector<8x1xf32>
    %cst_10 = arith.constant dense<0.000000e+00> : vector<8xf32>
    %25 = vector.multi_reduction <add>, %1, %cst_10 [1] : vector<8x256xf32> to vector<8xf32>
    %26 = vector.shape_cast %25 : vector<8xf32> to vector<8x1xf32>
    %cst_11 = arith.constant 2.560000e+02 : f32
    %27 = vector.broadcast %cst_11 : f32 to vector<8x1xf32>
    %28 = arith.divf %26, %27 : vector<8x1xf32>
    %29 = vector.broadcast %28 : vector<8x1xf32> to vector<8x256xf32>
    %30 = arith.subf %1, %29 : vector<8x256xf32>
    %31 = arith.mulf %30, %30 : vector<8x256xf32>
    %cst_12 = arith.constant dense<0.000000e+00> : vector<8xf32>
    %32 = vector.multi_reduction <add>, %31, %cst_12 [1] : vector<8x256xf32> to vector<8xf32>
    %33 = vector.shape_cast %32 : vector<8xf32> to vector<8x1xf32>
    %34 = arith.mulf %31, %30 : vector<8x256xf32>
    %cst_13 = arith.constant dense<0.000000e+00> : vector<8xf32>
    %35 = vector.multi_reduction <add>, %34, %cst_13 [1] : vector<8x256xf32> to vector<8xf32>
    %36 = vector.shape_cast %35 : vector<8xf32> to vector<8x1xf32>
    %37 = arith.mulf %31, %31 : vector<8x256xf32>
    %cst_14 = arith.constant dense<0.000000e+00> : vector<8xf32>
    %38 = vector.multi_reduction <add>, %37, %cst_14 [1] : vector<8x256xf32> to vector<8xf32>
    %39 = vector.shape_cast %38 : vector<8xf32> to vector<8x1xf32>
    %cst_15 = arith.constant 2.550000e+02 : f32
    %40 = vector.broadcast %cst_15 : f32 to vector<8x1xf32>
    %41 = arith.divf %33, %40 : vector<8x1xf32>
    %cst_16 = arith.constant 9.99999974E-6 : f32
    %42 = vector.broadcast %cst_16 : f32 to vector<8x1xf32>
    %43 = arith.addf %41, %42 : vector<8x1xf32>
    %44 = math.rsqrt %43 : vector<8x1xf32>
    %cst_17 = arith.constant 9.99999974E-6 : f32
    %45 = vector.broadcast %cst_17 : f32 to vector<8x1xf32>
    %46 = arith.addf %41, %45 : vector<8x1xf32>
    %47 = arith.mulf %46, %44 : vector<8x1xf32>
    %48 = arith.mulf %44, %24 : vector<8x1xf32>
    %49 = vector.broadcast %48 : vector<8x1xf32> to vector<8x256xf32>
    %50 = arith.mulf %30, %49 : vector<8x256xf32>
    %51 = vector.broadcast %5 : vector<8x1xf32> to vector<8x256xf32>
    %52 = arith.addf %50, %51 : vector<8x256xf32>
    %c0_18 = arith.constant 0 : index
    %c0_19 = arith.constant 0 : index
    %53 = vector.load %arg3[%c0_18, %c0_19] : memref<8x256xf32, #tpu.memory_space<vmem>>, vector<8x256xf32>
    tpu.vector_store %arg3[%c0_18, %c0_19], %52 {strides = array<i32>} : memref<8x256xf32, #tpu.memory_space<vmem>>, vector<8x256xf32>,
    %54 = arith.mulf %21, %47 : vector<8x1xf32>
    %55 = vector.broadcast %54 : vector<8x1xf32> to vector<8x256xf32>
    %56 = arith.mulf %7, %55 : vector<8x256xf32>
    %57 = vector.broadcast %28 : vector<8x1xf32> to vector<8x256xf32>
    %58 = arith.addf %56, %57 : vector<8x256xf32>
    %c0_20 = arith.constant 0 : index
    %c0_21 = arith.constant 0 : index
    %59 = vector.load %arg4[%c0_20, %c0_21] : memref<8x256xf32, #tpu.memory_space<vmem>>, vector<8x256xf32>
    tpu.vector_store %arg4[%c0_20, %c0_21], %58 {strides = array<i32>} : memref<8x256xf32, #tpu.memory_space<vmem>>, vector<8x256xf32>,
    %60 = arith.mulf %21, %21 : vector<8x1xf32>
    %61 = arith.mulf %44, %44 : vector<8x1xf32>
    %62 = arith.mulf %60, %21 : vector<8x1xf32>
    %63 = arith.mulf %13, %62 : vector<8x1xf32>
    %64 = vector.shape_cast %63 : vector<8x1xf32> to vector<1x8x1xf32>
    %cst_22 = arith.constant dense<0.000000e+00> : vector<1xf32>
    %65 = vector.multi_reduction <add>, %64, %cst_22 [1, 2] : vector<1x8x1xf32> to vector<1xf32>
    %66 = vector.shape_cast %65 : vector<1xf32> to vector<1x1x1xf32>
    %67 = vector.extract %66[0, 0, 0] : f32 from vector<1x1x1xf32>
    %68 = arith.mulf %60, %60 : vector<8x1xf32>
    %69 = arith.mulf %16, %68 : vector<8x1xf32>
    %70 = vector.shape_cast %69 : vector<8x1xf32> to vector<1x8x1xf32>
    %cst_23 = arith.constant dense<0.000000e+00> : vector<1xf32>
    %71 = vector.multi_reduction <add>, %70, %cst_23 [1, 2] : vector<1x8x1xf32> to vector<1xf32>
    %72 = vector.shape_cast %71 : vector<1xf32> to vector<1x1x1xf32>
    %73 = vector.extract %72[0, 0, 0] : f32 from vector<1x1x1xf32>
    %74 = arith.mulf %61, %44 : vector<8x1xf32>
    %75 = arith.mulf %36, %74 : vector<8x1xf32>
    %76 = vector.shape_cast %75 : vector<8x1xf32> to vector<1x8x1xf32>
    %cst_24 = arith.constant dense<0.000000e+00> : vector<1xf32>
    %77 = vector.multi_reduction <add>, %76, %cst_24 [1, 2] : vector<1x8x1xf32> to vector<1xf32>
    %78 = vector.shape_cast %77 : vector<1xf32> to vector<1x1x1xf32>
    %79 = vector.extract %78[0, 0, 0] : f32 from vector<1x1x1xf32>
    %80 = arith.mulf %61, %61 : vector<8x1xf32>
    %81 = arith.mulf %39, %80 : vector<8x1xf32>
    %82 = vector.shape_cast %81 : vector<8x1xf32> to vector<1x8x1xf32>
    %cst_25 = arith.constant dense<0.000000e+00> : vector<1xf32>
    %83 = vector.multi_reduction <add>, %82, %cst_25 [1, 2] : vector<1x8x1xf32> to vector<1xf32>
    %84 = vector.shape_cast %83 : vector<1xf32> to vector<1x1x1xf32>
    %85 = vector.extract %84[0, 0, 0] : f32 from vector<1x1x1xf32>
    %86 = tpu.iota {dimensions = array<i32: 2>} : vector<1x1x128xi32>
    %c0_i32 = arith.constant 0 : i32
    %87 = vector.broadcast %c0_i32 : i32 to vector<1x1x128xi32>
    %88 = arith.cmpi eq, %86, %87 : vector<1x1x128xi32>
    %c1_i32 = arith.constant 1 : i32
    %89 = vector.broadcast %c1_i32 : i32 to vector<1x1x128xi32>
    %90 = arith.cmpi eq, %86, %89 : vector<1x1x128xi32>
    %c2_i32 = arith.constant 2 : i32
    %91 = vector.broadcast %c2_i32 : i32 to vector<1x1x128xi32>
    %92 = arith.cmpi eq, %86, %91 : vector<1x1x128xi32>
    %c3_i32 = arith.constant 3 : i32
    %93 = vector.broadcast %c3_i32 : i32 to vector<1x1x128xi32>
    %94 = arith.cmpi eq, %86, %93 : vector<1x1x128xi32>
    %cst_26 = arith.constant 0.000000e+00 : f32
    %95 = vector.broadcast %85 : f32 to vector<1x1x128xf32>
    %96 = vector.broadcast %cst_26 : f32 to vector<1x1x128xf32>
    %97 = arith.select %94, %95, %96 : vector<1x1x128xi1>, vector<1x1x128xf32>
    %98 = vector.broadcast %79 : f32 to vector<1x1x128xf32>
    %99 = arith.select %92, %98, %97 : vector<1x1x128xi1>, vector<1x1x128xf32>
    %100 = vector.broadcast %73 : f32 to vector<1x1x128xf32>
    %101 = arith.select %90, %100, %99 : vector<1x1x128xi1>, vector<1x1x128xf32>
    %102 = vector.broadcast %67 : f32 to vector<1x1x128xf32>
    %103 = arith.select %88, %102, %101 : vector<1x1x128xi1>, vector<1x1x128xf32>
    %c0_27 = arith.constant 0 : index
    %c0_28 = arith.constant 0 : index
    %c0_29 = arith.constant 0 : index
    %104 = vector.load %arg5[%c0_27, %c0_28, %c0_29] : memref<1x1x128xf32, #tpu.memory_space<vmem>>, vector<1x1x128xf32>
    tpu.vector_store %arg5[%c0_27, %c0_28, %c0_29], %103 {strides = array<i32>} : memref<1x1x128xf32, #tpu.memory_space<vmem>>, vector<1x1x128xf32>,
    return
  }
  func.func @transform_0(%arg0: i32) -> (i32, i32) {
    %c0_i32 = arith.constant 0 : i32
    %c0_i32_0 = arith.constant 0 : i32
    return %arg0, %c0_i32 : i32, i32
  }
  func.func @transform_1(%arg0: i32) -> (i32, i32) {
    %c0_i32 = arith.constant 0 : i32
    %c0_i32_0 = arith.constant 0 : i32
    return %arg0, %c0_i32 : i32, i32
  }
  func.func @transform_2(%arg0: i32) -> (i32, i32) {
    %c0_i32 = arith.constant 0 : i32
    %c0_i32_0 = arith.constant 0 : i32
    return %arg0, %c0_i32 : i32, i32
  }
  func.func @transform_3(%arg0: i32) -> (i32, i32) {
    %c0_i32 = arith.constant 0 : i32
    %c0_i32_0 = arith.constant 0 : i32
    return %arg0, %c0_i32 : i32, i32
  }
  func.func @transform_4(%arg0: i32) -> (i32, i32, i32) {
    %c0_i32 = arith.constant 0 : i32
    %c0_i32_0 = arith.constant 0 : i32
    %c0_i32_1 = arith.constant 0 : i32
    return %arg0, %c0_i32, %c0_i32_0 : i32, i32, i32
  }
}

</mosaic_0001>

<bundles_post_ra>
// kernel: tpu_custom_call.1
= control target key start
LH: loop header
LB: loop body
LE: loop exit
PB: predicated region body
PF: predicated region fallthrough
CT: control target
= control target key end

     0   :  { %10 = vsyncpa [#allocation3], 0  ;;  %s405_s0 = inlined_call_operand.hbm [shape: f32[8,256], index: 0, kind: input, shape index: {}]   ;;  %s406_s1 = inlined_call_operand.hbm [shape: f32[8,256], index: 1, kind: input, shape index: {}]   ;;  %s407_s2 = inlined_call_operand.hbm [shape: f32[8,256], index: 2, kind: output, shape index: {0}]   ;;  %s408_s3 = inlined_call_operand.hbm [shape: f32[8,256], index: 3, kind: output, shape index: {1}]   ;;  %s409_s4 = inlined_call_operand.hbm [shape: f32[1,1,128], index: 4, kind: output, shape index: {2}]  }
   0x1   :  { %11 = vsyncpa [#allocation6], 0 }
   0x2   :  { %12 = vsyncpa [#allocation4], 0 }
   0x3   :  { %13 = vsyncpa [#allocation9], 0  ;;  %s344_s15 = smov [#allocation2]   ;;  %s345_s17 = smov [#allocation5]  }
   0x4   :  { %s20_s16 = sshll.u32 %s344_s15, 4  ;;  %s30_s18 = sshll.u32 %s345_s17, 4  ;;  %s21_s16 = int_to_ptr.vmem [resolvable:$true] %s20_s16  ;;  %s31_s18 = int_to_ptr.vmem [resolvable:$true] %s30_s18 }
   0x5   :  { %s244_s19 = scalar_lea.vmem %s21_s16, 256  ;;  %p249_p1 = scmp.lt.s32.totalorder %s21_s16, %s21_s16 }
   0x6   :  { %p245_p0 = scmp.ne.s32.totalorder %s21_s16, %s244_s19  ;;  %p250_p2 = scmp.lt.s32.totalorder %s244_s19, %s244_s19 }
   0x8   :  { %p251_p3 = por %p250_p2, %p249_p1 }
   0xa   :  { %p252_p4 = pnand %p251_p3, %p245_p0 }
   0xc   :  { %255 = shalt.err (!%p252_p4)
}
   0xd   :  { %23 = dma.hbm_to_vmem [thread:$0]  %s405_s0, 256, %s21_s16, [#allocation3]  }
   0xe   :  { %s264_s22 = scalar_lea.vmem %s31_s18, 256  ;;  %p269_p6 = scmp.lt.s32.totalorder %s31_s18, %s31_s18 }
   0xf   :  { %p265_p5 = scmp.ne.s32.totalorder %s31_s18, %s264_s22  ;;  %p270_p7 = scmp.lt.s32.totalorder %s264_s22, %s264_s22 }
  0x11   :  { %p271_p8 = por %p270_p7, %p269_p6 }
  0x13   :  { %p272_p9 = pnand %p271_p8, %p265_p5 }
  0x15   :  { %275 = shalt.err (!%p272_p9)
}
  0x16   :  { %33 = dma.hbm_to_vmem [thread:$0]  %s406_s1, 256, %s31_s18, [#allocation6]  }
  0x17   :  { %336 = dma.done.wait [#allocation3], 256  }
  0x18   :  { %337 = vsyncadd [#allocation3], 4294967040 }
  0x19   :  { %338 = dma.done.wait [#allocation6], 256  }
  0x1a   :  { %339 = vsyncadd [#allocation6], 4294967040  ;;  %v40_v0 = vld [vmem:[#allocation2] sm:$0xff]  ;;  %v41_v1 = vld [vmem:[#allocation2 + $0x8] sm:$0xff]  ;;  %vm114_vm0 = vcmask 7168   ;;  %s346_s0 = smov [#allocation8]  }
  0x1b   :  { %v42_v2 = vld [vmem:[#allocation5] sm:$0xff]  ;;  %v44_v3 = vadd.f32 %v41_v1, %v40_v0  ;;  %v43_v4 = vld [vmem:[#allocation5 + $0x8] sm:$0xff]  ;;  %s192_s1 = sshll.u32 %s346_s0, 4  ;;  %s347_s25 = smov [#allocation7]   ;;  %s193_s1 = int_to_ptr.vmem [resolvable:$true] %s192_s1 }
  0x1c   :  { %v71_v5 = vadd.f32 %v43_v4, %v42_v2  ;;  %s182_s26 = sshll.u32 %s347_s25, 4  ;;  %s276_s27 = scalar_lea.vmem %s193_s1, 256  ;;  %s183_s26 = int_to_ptr.vmem [resolvable:$true] %s182_s26 }
  0x1d   :  { %45 = vadd.xlane.f32.xlu0 %v44_v3  ;;  %p277_p10 = scmp.ne.s32.totalorder %s193_s1, %s276_s27  ;;  %p281_p11 = scmp.lt.s32.totalorder %s193_s1, %s193_s1 }
  0x1e   :  { %p282_p12 = scmp.lt.s32.totalorder %s276_s27, %s276_s27 }
  0x20   :  { %p283_p13 = por %p282_p12, %p281_p11 }
  0x21   :  { %72 = vadd.xlane.f32.xlu0 %v71_v5 }
  0x22   :  { %p284_p0 = pnand %p283_p13, %p277_p10 }
  0xa6   :  { %v46_v6 = vpop.xlane.xlu0 %45 }
  0xa7   :  { %v380_v7 = vmul.f32 0.00390625, %v46_v6 }
  0xa9   :  { %v49_v8 = vsub.f32 %v40_v0, %v380_v7  ;;  %v50_v9 = vsub.f32 %v41_v1, %v380_v7 }
  0xaa   :  { %v73_v10 = vpop.xlane.xlu0 %72 }
  0xab   :  { %v384_v11 = vmul.f32 0.00390625, %v73_v10  ;;  %v51_v12 = vmul.f32 %v49_v8, %v49_v8  ;;  %v52_v13 = vmul.f32 %v50_v9, %v50_v9 }
  0xad   :  { %v75_v14 = vsub.f32 %v42_v2, %v384_v11  ;;  %v76_v15 = vsub.f32 %v43_v4, %v384_v11  ;;  %v53_v16 = vadd.f32 %v52_v13, %v51_v12  ;;  %v56_v17 = vmul.f32 %v51_v12, %v49_v8 }
  0xae   :  { %v57_v18 = vmul.f32 %v52_v13, %v50_v9  ;;  %v61_v22 = vmul.f32 %v51_v12, %v51_v12  ;;  %v62_v26 = vmul.f32 %v52_v13, %v52_v13 }
  0xaf   :  { %54 = vadd.xlane.f32.xlu1 %v53_v16  ;;  %v77_v19 = vmul.f32 %v75_v14, %v75_v14  ;;  %v78_v20 = vmul.f32 %v76_v15, %v76_v15 }
  0xb0   :  { %v58_v21 = vadd.f32 %v57_v18, %v56_v17  ;;  %v63_v28 = vadd.f32 %v62_v26, %v61_v22 }
  0xb1   :  { %v79_v23 = vadd.f32 %v78_v20, %v77_v19  ;;  %v82_v24 = vmul.f32 %v77_v19, %v75_v14  ;;  %v83_v25 = vmul.f32 %v78_v20, %v76_v15  ;;  %v87_v29 = vmul.f32 %v77_v19, %v77_v19 }
  0xb2   :  { %59 = vadd.xlane.f32.xlu0 %v58_v21  ;;  %v88_v30 = vmul.f32 %v78_v20, %v78_v20 }
  0xb3   :  { %80 = vadd.xlane.f32.xlu1 %v79_v23  ;;  %v84_v27 = vadd.f32 %v83_v25, %v82_v24 }
  0xb4   :  { %v89_v31 = vadd.f32 %v88_v30, %v87_v29 }
  0xb6   :  { %85 = vadd.xlane.f32.xlu0 %v84_v27 }
  0xb7   :  { %64 = vadd.xlane.f32.xlu1 %v63_v28 }
  0xbb   :  { %90 = vadd.xlane.f32.xlu1 %v89_v31 }
 0x138   :  { %v55_v32 = vpop.xlane.xlu1 %54 }
 0x139   :  { %v67_v33 = vmul.f32 0.003921569, %v55_v32 }
 0x13b   :  { %v68_v34 = vadd.f32 1e-05, %v67_v33  ;;  %v60_v40 = vpop.xlane.xlu0 %59 }
 0x13c   :  { %v81_v35 = vpop.xlane.xlu1 %80 }
 0x13d   :  { %232 = vrsqrt.f32 %v68_v34  ;;  %v92_v36 = vmul.f32 0.003921569, %v81_v35 }
 0x13f   :  { %v93_v37 = vadd.f32 1e-05, %v92_v36  ;;  %v86_v55 = vpop.xlane.xlu0 %85 }
 0x140   :  { %v65_v41 = vpop.xlane.xlu1 %64 }
 0x141   :  { %234 = vrsqrt.f32 %v93_v37 }
 0x144   :  { %v91_v56 = vpop.xlane.xlu1 %90 }
 0x14a   :  { %v233_v38 = vpop.eup %232 }
 0x14b   :  { %v110_v39 = vmul.f32 %v233_v38, %v233_v38  ;;  %v70_v45 = vmul.f32 %v233_v38, %v68_v34 }
 0x14d   :  { %v112_v42 = vmul.f32 %v233_v38, %v110_v39  ;;  %v125_v43 = vmul.f32 %v110_v39, %v110_v39 }
 0x14e   :  { %v235_v44 = vpop.eup %234 }
 0x14f   :  { %v113_v46 = vmul.f32 %v112_v42, %v60_v40  ;;  %v95_v47 = vmul.f32 %v235_v44, %v93_v37  ;;  %v111_v48 = vmul.f32 %v235_v44, %v235_v44  ;;  %v126_v49 = vmul.f32 %v125_v43, %v65_v41 }
 0x150   :  { %v96_v50 = vmul.f32 %v235_v44, %v70_v45 }
 0x151   :  { %v103_v51 = vmul.f32 %v233_v38, %v95_v47  ;;  %v137_v52 = vmul.f32 %v235_v44, %v111_v48  ;;  %v149_v53 = vmul.f32 %v111_v48, %v111_v48  ;;  %v127_v54 = vsel %vm114_vm0, %v126_v49, 0.0 }
 0x152   :  { %128 = vadd.xlane.f32.xlu1 %v127_v54  ;;  %v115_v57 = vsel %vm114_vm0, %v113_v46, 0.0  ;;  %v97_v58 = vmul.f32 %v96_v50, %v75_v14  ;;  %v98_v59 = vmul.f32 %v96_v50, %v76_v15 }
 0x153   :  { %v104_v60 = vmul.f32 %v103_v51, %v49_v8  ;;  %v105_v61 = vmul.f32 %v103_v51, %v50_v9  ;;  %v138_v62 = vmul.f32 %v137_v52, %v86_v55  ;;  %v150_v63 = vmul.f32 %v149_v53, %v91_v56  ;;  %116 = vadd.xlane.f32.xlu0 %v115_v57 }
 0x154   :  { %v99_v0 = vadd.f32 %v97_v58, %v380_v7  ;;  %v100_v1 = vadd.f32 %v98_v59, %v380_v7 }
 0x155   :  { %v151_v2 = vsel %vm114_vm0, %v150_v63, 0.0  ;;  %v139_v3 = vsel %vm114_vm0, %v138_v62, 0.0  ;;  %v106_v4 = vadd.f32 %v104_v60, %v384_v11  ;;  %v107_v5 = vadd.f32 %v105_v61, %v384_v11 }
 0x156   :  { %152 = vadd.xlane.f32.xlu1 %v151_v2  ;;  %101 = vst [vmem:[#allocation7] sm:$0xff] %v99_v0  ;;  %102 = vst [vmem:[#allocation7 + $0x8] sm:$0xff] %v100_v1 }
 0x157   :  { %140 = vadd.xlane.f32.xlu0 %v139_v3  ;;  %108 = vst [vmem:[#allocation8] sm:$0xff] %v106_v4  ;;  %109 = vst [vmem:[#allocation8 + $0x8] sm:$0xff] %v107_v5 }
 0x158   :  { %287 = shalt.err (!%p284_p0)
}
 0x159   :  { %195 = dma.vmem_to_hbm [thread:$0]  %s193_s1, 256, %s408_s3, [#allocation9]  }
 0x15a   :  { %s296_s30 = scalar_lea.vmem %s183_s26, 256  ;;  %p301_p2 = scmp.lt.s32.totalorder %s183_s26, %s183_s26 }
 0x15b   :  { %p297_p1 = scmp.ne.s32.totalorder %s183_s26, %s296_s30  ;;  %p302_p3 = scmp.lt.s32.totalorder %s296_s30, %s296_s30 }
 0x15d   :  { %p303_p4 = por %p302_p3, %p301_p2 }
 0x15f   :  { %p304_p5 = pnand %p303_p4, %p297_p1 }
 0x161   :  { %307 = shalt.err (!%p304_p5)
}
 0x162   :  { %185 = dma.vmem_to_hbm [thread:$0]  %s183_s26, 256, %s407_s2, [#allocation4]   ;;  %v161_v34 = vlaneseq }
 0x163   :  { %s348_s9 = smov [#allocation10]  }
 0x164   :  { %v162_v35 = vand.u32 127, %v161_v34  ;;  %s202_s10 = sshll.u32 %s348_s9, 4  ;;  %s203_s10 = int_to_ptr.vmem [resolvable:$true] %s202_s10 }
 0x165   :  { %s316_s11 = scalar_lea.vmem %s203_s10, 16  ;;  %s320_s12 = scalar_lea.vmem %s203_s10, 32 }
 0x166   :  { %vm166_vm1 = vcmp.eq.s32.totalorder %v162_v35, 3  ;;  %vm165_vm2 = vcmp.eq.s32.totalorder %v162_v35, 2  ;;  %vm164_vm3 = vcmp.eq.s32.totalorder %v162_v35, 1  ;;  %vm163_vm4 = vcmp.eq.s32.totalorder %v162_v35, 0  ;;  %p317_p6 = scmp.ne.s32.totalorder %s203_s10, %s316_s11  ;;  %p321_p7 = scmp.lt.s32.totalorder %s203_s10, %s203_s10 }
 0x167   :  { %p322_p8 = scmp.lt.s32.totalorder %s320_s12, %s316_s11 }
 0x169   :  { %p323_p9 = por %p322_p8, %p321_p7 }
 0x16b   :  { %p324_p10 = pnand %p323_p9, %p317_p6 }
 0x1db   :  { %v129_v6 = vpop.xlane.xlu1 %128 }
 0x1dc   :  { %v130_v7 = vrot.slane %v129_v6, 4  ;;  %v117_v8 = vpop.xlane.xlu0 %116 }
 0x1dd   :  { %v118_v9 = vrot.slane %v117_v8, 4 }
 0x1de   :  { %v131_v10 = vadd.f32 %v130_v7, %v129_v6 }
 0x1df   :  { %v119_v11 = vadd.f32 %v118_v9, %v117_v8  ;;  %v153_v12 = vpop.xlane.xlu1 %152 }
 0x1e0   :  { %v132_v13 = vrot.slane %v131_v10, 2  ;;  %v154_v14 = vrot.slane %v153_v12, 4  ;;  %v141_v15 = vpop.xlane.xlu0 %140 }
 0x1e1   :  { %v120_v16 = vrot.slane %v119_v11, 2  ;;  %v142_v17 = vrot.slane %v141_v15, 4 }
 0x1e2   :  { %v155_v18 = vadd.f32 %v154_v14, %v153_v12  ;;  %v133_v19 = vadd.f32 %v132_v13, %v131_v10 }
 0x1e3   :  { %v143_v20 = vadd.f32 %v142_v17, %v141_v15  ;;  %v121_v21 = vadd.f32 %v120_v16, %v119_v11 }
 0x1e4   :  { %v156_v22 = vrot.slane %v155_v18, 2  ;;  %v134_v23 = vrot.slane %v133_v19, 1 }
 0x1e5   :  { %v144_v24 = vrot.slane %v143_v20, 2  ;;  %v122_v25 = vrot.slane %v121_v21, 1 }
 0x1e6   :  { %v157_v26 = vadd.f32 %v156_v22, %v155_v18  ;;  %v135_v27 = vadd.f32 %v134_v23, %v133_v19 }
 0x1e7   :  { %v145_v28 = vadd.f32 %v144_v24, %v143_v20  ;;  %v123_v29 = vadd.f32 %v122_v25, %v121_v21 }
 0x1e8   :  { %v158_v30 = vrot.slane %v157_v26, 1 }
 0x1e9   :  { %219 = vpush %v123_v29  ;;  %v146_v31 = vrot.slane %v145_v28, 1 }
 0x1ea   :  { %221 = vpush %v135_v27  ;;  %v159_v32 = vadd.f32 %v158_v30, %v157_v26 }
 0x1eb   :  { %v147_v33 = vadd.f32 %v146_v31, %v145_v28 }
 0x1ed   :  { %223 = vpush %v147_v33 }
 0x1ee   :  { %225 = vpush %v159_v32 }
 0x21a   :  { %s220_s2 = spop %219 }
 0x21b   :  { %s222_s3 = spop %221  ;;  %v173_v41 = vstv %s220_s2 }
 0x21c   :  { %v171_v39 = vstv %s222_s3 }
 0x21e   :  { %s224_s7 = spop %223 }
 0x21f   :  { %v169_v36 = vstv %s224_s7  ;;  %s226_s8 = spop %225 }
 0x220   :  { %v167_v37 = vstv %s226_s8 }
 0x221   :  { %v168_v38 = vsel %vm166_vm1, %v167_v37, 0.0 }
 0x222   :  { %v170_v40 = vsel %vm165_vm2, %v169_v36, %v168_v38 }
 0x223   :  { %v172_v42 = vsel %vm164_vm3, %v171_v39, %v170_v40 }
 0x224   :  { %v174_v43 = vsel %vm163_vm4, %v173_v41, %v172_v42 }
 0x225   :  { %175 = vst [vmem:[#allocation10] sm:$0x1] %v174_v43 }
 0x226   :  { %327 = shalt.err (!%p324_p10)
}
 0x227   :  { %205 = dma.vmem_to_hbm [thread:$0]  %s203_s10, 16, %s409_s4, [#allocation9]  }
 0x228   :  { %340 = dma.done.wait [#allocation4], 256  }
 0x229   :  { %341 = vsyncadd [#allocation4], 4294967040 }
 0x22a   :  { %342 = dma.done.wait [#allocation9], 272  }
 0x22b   :  { %343 = vsyncadd [#allocation9], 4294967024 }
 0x22c   :  { %215 = vsyncpa [#allocation3], 1 }
 0x22d   :  { %216 = vsyncpa [#allocation6], 1 }
 0x22e   :  { %217 = vsyncpa [#allocation4], 1 }
 0x22f   :  { %218 = vsyncpa [#allocation9], 1 }

</bundles_post_ra>
